<compile_context>
chip_gen: v7x
topology: tpu7x:2x2x1
jax: 0.10.0
libtpu: 0.0.40
codegen_flags: <defaults>
</compile_context>

<pallas_src>
import functools

import jax
import jax.numpy as jnp
from jax.experimental import pallas as pl
from jax.experimental.pallas import tpu as pltpu

B, C, H, W = 2, 3, 16, 16          # small synthetic shapes (real model: 3x160x160)
D_IN = C * H * W                   # flattened image features (768 here, 76800 real)
EMB = 512                          # InceptionResnetV1 embedding size
P_DROP = 0.75                      # nn.Dropout(dropout_rate=0.75)
OUT_LANES = 128                    # lane-dense output slab width
NJ = 2                             # EMB column blocks ("parallel" axis; feeds both v7x TCs)
TK_DEFAULT = 8192                  # K-tile for streamed weight (int8 tile = 2 MiB)
SINGLE_SHOT_MAX_K = 4096           # below this the whole int8 weight fits VMEM comfortably


def quantize_backbone(w):
    """Per-output-channel symmetric int8 quantization of the frozen backbone weight."""
    amax = jnp.max(jnp.abs(w), axis=0, keepdims=True)            # (1, EMB)
    scale = jnp.maximum(amax, 1e-8) / 127.0
    wq = jnp.clip(jnp.round(w / scale), -127, 127).astype(jnp.int8)
    return wq, scale.astype(jnp.float32)


def siamese_single_kernel(diff_ref, wb_ref, comb_ref, out_ref):
    # One-shot path: whole int8 weight resident in VMEM; no reduction pipeline.
    emb = jnp.dot(diff_ref[...], wb_ref[...].astype(jnp.bfloat16),
                  preferred_element_type=jnp.float32)
    # comb = dequant_scale * dropout_mask * w_fc  (scale > 0, so abs commutes)
    res = jnp.sum(jnp.abs(emb) * comb_ref[...], axis=-1, keepdims=True)
    out_ref[...] = jnp.broadcast_to(res, out_ref.shape)          # lane-dense store


def siamese_tiled_kernel(diff_ref, wb_ref, comb_ref, out_ref, acc_ref):
    # grid = (NJ column blocks [parallel], nk K-tiles [arbitrary / reduction])
    k = pl.program_id(1)

    @pl.when(k == 0)
    def _():
        acc_ref[...] = jnp.zeros_like(acc_ref)

    # Streamed int8 weight tile -> bf16 for the MXU; f32 accumulation.
    acc_ref[...] += jnp.dot(diff_ref[...], wb_ref[...].astype(jnp.bfloat16),
                            preferred_element_type=jnp.float32)

    @pl.when(k == pl.num_programs(1) - 1)
    def _():
        # Partial fc lane-sum for this EMB column block (abs * scale*mask*wfc).
        res = jnp.sum(jnp.abs(acc_ref[...]) * comb_ref[...], axis=-1,
                      keepdims=True)
        out_ref[...] = jnp.broadcast_to(res, out_ref.shape)


@functools.partial(jax.jit, static_argnames=("training", "force_tiled", "tk"))
def siamese_forward(input1, input2, wq, w_scale, w_fc, b_fc, dropout_key,
                    training=True, force_tiled=False, tk=None):
    """input1/input2: (B, C, H, W) f32 NCHW; wq int8 (D_IN, EMB); returns (B, 1) f32."""
    bsz = input1.shape[0]
    x1 = input1.reshape(bsz, -1).astype(jnp.float32)
    x2 = input2.reshape(bsz, -1).astype(jnp.float32)
    d_in = x1.shape[1]
    emb = wq.shape[1]

    # diff-before-matmul fusion (valid only for the linear backbone stand-in).
    diff = (x1 - x2).astype(jnp.bfloat16)

    # Inverted dropout mask (pre-scaled); all-ones at eval (nn.Dropout semantics).
    if training:
        keep = jax.random.bernoulli(dropout_key, 1.0 - P_DROP, (bsz, emb))
        mask = keep.astype(jnp.float32) * jnp.float32(1.0 / (1.0 - P_DROP))
    else:
        mask = jnp.ones((bsz, emb), jnp.float32)

    # Fold int8 dequant scale, dropout mask, and fc weight into one factor:
    #   out_b = sum_j |(diff @ Wq)_bj| * scale_j * mask_bj * wfc_j  + b_fc
    combined = mask * (w_scale * w_fc.reshape(1, emb)).astype(jnp.float32)

    if force_tiled or d_in > SINGLE_SHOT_MAX_K:
        # ---- real-scale path: K-tiled weight streaming + EMB column split ----
        tk = TK_DEFAULT if tk is None else tk
        nk = (d_in + tk - 1) // tk                 # cdiv; tail is zero-padded
        d_pad = nk * tk
        if d_pad != d_in:
            diff = jnp.pad(diff, ((0, 0), (0, d_pad - d_in)))
            wq = jnp.pad(wq, ((0, d_pad - d_in), (0, 0)))
        nj = NJ
        eb = emb // nj

        out_pad = pl.pallas_call(
            siamese_tiled_kernel,
            out_shape=jax.ShapeDtypeStruct((bsz, nj * OUT_LANES), jnp.float32),
            grid_spec=pltpu.PrefetchScalarGridSpec(
                num_scalar_prefetch=0,
                grid=(nj, nk),
                in_specs=[
                    pl.BlockSpec((bsz, tk), lambda j, k: (0, k)),   # diff K-slice (bf16)
                    pl.BlockSpec((tk, eb), lambda j, k: (k, j)),    # int8 weight tile
                    pl.BlockSpec((bsz, eb), lambda j, k: (0, j)),   # scale*mask*wfc slice
                ],
                out_specs=pl.BlockSpec((bsz, OUT_LANES), lambda j, k: (0, j)),
                scratch_shapes=[pltpu.VMEM((bsz, eb), jnp.float32)],  # f32 accumulator
            ),
            compiler_params=pltpu.CompilerParams(
                dimension_semantics=("parallel", "arbitrary"),
            ),
        )(diff, wq, combined)

        # Sum the per-column-block partials; lane 0 of each block carries the value.
        parts = out_pad.reshape(bsz, nj, OUT_LANES)[:, :, 0]
        out = jnp.sum(parts, axis=1, keepdims=True)
    else:
        # ---- small-K path: single shot, no pipeline, no scratch ----
        out_pad = pl.pallas_call(
            siamese_single_kernel,
            out_shape=jax.ShapeDtypeStruct((bsz, OUT_LANES), jnp.float32),
            grid_spec=pltpu.PrefetchScalarGridSpec(
                num_scalar_prefetch=0,
                grid=(1,),
                in_specs=[
                    pl.BlockSpec((bsz, d_in), lambda i: (0, 0)),
                    pl.BlockSpec((d_in, emb), lambda i: (0, 0)),
                    pl.BlockSpec((bsz, emb), lambda i: (0, 0)),
                ],
                out_specs=pl.BlockSpec((bsz, OUT_LANES), lambda i: (0, 0)),
            ),
        )(diff, wq, combined)
        out = out_pad[:, :1]

    return out + b_fc.reshape(1, 1).astype(jnp.float32)


if __name__ == "__main__":
    key = jax.random.PRNGKey(0)
    k1, k2, k3, k4, k5, k_drop = jax.random.split(key, 6)

    # deterministic example inputs
    input1 = jax.random.normal(k1, (B, C, H, W), jnp.float32)
    input2 = jax.random.normal(k2, (B, C, H, W), jnp.float32)

    # deterministic parameter init
    w_backbone = (jax.random.normal(k3, (D_IN, EMB), jnp.float32)
                  * jnp.float32(1.0 / (D_IN ** 0.5)))            # frozen backbone proxy
    bound = 1.0 / (EMB ** 0.5)                                   # PyTorch Linear init range
    w_fc = jax.random.uniform(k4, (1, EMB), jnp.float32, -bound, bound)
    b_fc = jax.random.uniform(k5, (1,), jnp.float32, -bound, bound)

    # Quantize the frozen backbone weight ONCE (it never changes).
    wq, w_scale = quantize_backbone(w_backbone)

    # 1) single-shot path (the one the demo shape actually uses)
    out = siamese_forward(input1, input2, wq, w_scale, w_fc, b_fc, k_drop,
                          training=True)
    jax.block_until_ready(out)
    assert out.shape == (B, 1) and out.dtype == jnp.float32
    assert bool(jnp.all(jnp.isfinite(out)))

    # 2) tiled / column-split path (real-scale structure) forced at small shape
    out_tiled = siamese_forward(input1, input2, wq, w_scale, w_fc, b_fc, k_drop,
                                training=True, force_tiled=True, tk=256)
    jax.block_until_ready(out_tiled)
    assert out_tiled.shape == (B, 1)
    assert bool(jnp.allclose(out, out_tiled, rtol=1e-3, atol=1e-3))

    # 3) pure-JAX reference with the same quantized weight / dropout mask
    diff_f32 = ((input1.reshape(B, -1) - input2.reshape(B, -1))
                .astype(jnp.bfloat16).astype(jnp.float32))
    w_deq = wq.astype(jnp.float32) * w_scale
    emb_ref = jnp.abs(jnp.dot(diff_f32, w_deq,
                              precision=jax.lax.Precision.HIGHEST))
    keep = (jax.random.bernoulli(k_drop, 1.0 - P_DROP, (B, EMB))
            .astype(jnp.float32) / (1.0 - P_DROP))
    ref = jnp.dot(emb_ref * keep, w_fc.reshape(EMB, 1),
                  precision=jax.lax.Precision.HIGHEST) + b_fc.reshape(1, 1)
    assert bool(jnp.allclose(out, ref, rtol=2e-2, atol=2e-2))

    print("KERNEL_OK")
</pallas_src>

<mosaic_0001>
module attributes {stable_mosaic.version = 11 : i64} {
  func.func @siamese_single_kernel(%arg0: i32, %arg1: memref<2x768xbf16, #tpu.memory_space<vmem>>, %arg2: memref<768x512xi8, #tpu.memory_space<vmem>>, %arg3: memref<2x512xf32, #tpu.memory_space<vmem>>, %arg4: memref<2x128xf32, #tpu.memory_space<vmem>>) attributes {dimension_semantics = [#tpu.dimension_semantics<arbitrary>], iteration_bounds = array<i64: 1>, scalar_prefetch = 0 : i64, scratch_operands = 0 : i64, tpu.core_type = #tpu.core_type<tc>, window_params = [{pipeline_mode = #tpu.pipeline_mode<synchronous>, transform_indices = @transform_0, window_bounds = array<i64: 2, 768>}, {pipeline_mode = #tpu.pipeline_mode<synchronous>, transform_indices = @transform_1, window_bounds = array<i64: 768, 512>}, {pipeline_mode = #tpu.pipeline_mode<synchronous>, transform_indices = @transform_2, window_bounds = array<i64: 2, 512>}, {pipeline_mode = #tpu.pipeline_mode<synchronous>, transform_indices = @transform_3, window_bounds = array<i64: 2, 128>}]} {
    %c0 = arith.constant 0 : index
    %c0_0 = arith.constant 0 : index
    %0 = vector.load %arg1[%c0, %c0_0] : memref<2x768xbf16, #tpu.memory_space<vmem>>, vector<2x768xbf16>
    %c0_1 = arith.constant 0 : index
    %c0_2 = arith.constant 0 : index
    %1 = vector.load %arg2[%c0_1, %c0_2] : memref<768x512xi8, #tpu.memory_space<vmem>>, vector<768x512xi8>
    %2 = arith.sitofp %1 : vector<768x512xi8> to vector<768x512xbf16>
    %cst = arith.constant dense<0.000000e+00> : vector<2x512xf32>
    %3 = tpu.matmul %0, %2, %cst {dimension_numbers = #tpu.dot_dimension_numbers<[1], [0], [0], [1], [0, 0, 1, 1], [], []>} : vector<2x768xbf16>, vector<768x512xbf16>, vector<2x512xf32> -> vector<2x512xf32>
    %4 = math.absf %3 : vector<2x512xf32>
    %c0_3 = arith.constant 0 : index
    %c0_4 = arith.constant 0 : index
    %5 = vector.load %arg3[%c0_3, %c0_4] : memref<2x512xf32, #tpu.memory_space<vmem>>, vector<2x512xf32>
    %6 = arith.mulf %4, %5 : vector<2x512xf32>
    %cst_5 = arith.constant dense<0.000000e+00> : vector<2xf32>
    %7 = vector.multi_reduction <add>, %6, %cst_5 [1] : vector<2x512xf32> to vector<2xf32>
    %8 = vector.shape_cast %7 : vector<2xf32> to vector<2x1xf32>
    %9 = vector.shape_cast %8 : vector<2x1xf32> to vector<2x1xf32>
    %10 = vector.broadcast %9 : vector<2x1xf32> to vector<2x128xf32>
    %c0_6 = arith.constant 0 : index
    %c0_7 = arith.constant 0 : index
    %11 = vector.load %arg4[%c0_6, %c0_7] : memref<2x128xf32, #tpu.memory_space<vmem>>, vector<2x128xf32>
    tpu.vector_store %arg4[%c0_6, %c0_7], %10 {strides = array<i32>} : memref<2x128xf32, #tpu.memory_space<vmem>>, vector<2x128xf32>,
    return
  }
  func.func @transform_0(%arg0: i32) -> (i32, i32) {
    %c0_i32 = arith.constant 0 : i32
    %c0_i32_0 = arith.constant 0 : i32
    %c0_i32_1 = arith.constant 0 : i32
    return %c0_i32, %c0_i32_0 : i32, i32
  }
  func.func @transform_1(%arg0: i32) -> (i32, i32) {
    %c0_i32 = arith.constant 0 : i32
    %c0_i32_0 = arith.constant 0 : i32
    %c0_i32_1 = arith.constant 0 : i32
    return %c0_i32, %c0_i32_0 : i32, i32
  }
  func.func @transform_2(%arg0: i32) -> (i32, i32) {
    %c0_i32 = arith.constant 0 : i32
    %c0_i32_0 = arith.constant 0 : i32
    %c0_i32_1 = arith.constant 0 : i32
    return %c0_i32, %c0_i32_0 : i32, i32
  }
  func.func @transform_3(%arg0: i32) -> (i32, i32) {
    %c0_i32 = arith.constant 0 : i32
    %c0_i32_0 = arith.constant 0 : i32
    %c0_i32_1 = arith.constant 0 : i32
    return %c0_i32, %c0_i32_0 : i32, i32
  }
}

</mosaic_0001>

<bundles_post_ra>
// kernel: mul.17
= control target key start
LH: loop header
LB: loop body
LE: loop exit
PB: predicated region body
PF: predicated region fallthrough
CT: control target
= control target key end

     0   :  { %s100_s0 = inlined_call_operand.vmem [shape: f32[1,512], index: 0, kind: input, shape index: {}]   ;;  %s101_s1 = inlined_call_operand.vmem [shape: f32[1,512], index: 1, kind: input, shape index: {}]   ;;  %s102_s2 = inlined_call_operand.vmem [shape: f32[1,512], index: 2, kind: output, shape index: {}]  }
   0x1   :  { %v3_v0 = vld [vmem:[%s100_s0] sm:$0x1]  ;;  %v40_v2 = vld [vmem:[%s100_s0 + $0x1] sm:$0x1]  ;;  %v43_v5 = vld [vmem:[%s100_s0 + $0x2] sm:$0x1] }
   0x2   :  { %v4_v1 = vld [vmem:[%s101_s1] sm:$0x1]  ;;  %v41_v4 = vld [vmem:[%s101_s1 + $0x1] sm:$0x1]  ;;  %v44_v6 = vld [vmem:[%s101_s1 + $0x2] sm:$0x1] }
   0x3   :  { %v7_v3 = vmul.f32 %v4_v1, %v3_v0  ;;  %v16_v7 = vmul.f32 %v41_v4, %v40_v2  ;;  %v26_v8 = vmul.f32 %v44_v6, %v43_v5  ;;  %v46_v9 = vld [vmem:[%s100_s0 + $0x3] sm:$0x1] }
   0x4   :  { %v47_v10 = vld [vmem:[%s101_s1 + $0x3] sm:$0x1] }
   0x5   :  { %9 = vst [vmem:[%s102_s2] sm:$0x1] %v7_v3  ;;  %v36_v11 = vmul.f32 %v47_v10, %v46_v9  ;;  %42 = vst [vmem:[%s102_s2 + $0x1] sm:$0x1] %v16_v7 }
   0x6   :  { %45 = vst [vmem:[%s102_s2 + $0x2] sm:$0x1] %v26_v8 }
   0x7   :  { %48 = vst [vmem:[%s102_s2 + $0x3] sm:$0x1] %v36_v11 }

// kernel: siamese_forward.1
= control target key start
LH: loop header
LB: loop body
LE: loop exit
PB: predicated region body
PF: predicated region fallthrough
CT: control target
= control target key end

     0   :  { %8 = vsyncpa [#allocation3], 0  ;;  %s711_s12 = smov [#allocation2]   ;;  %s803_s0 = inlined_call_operand.vmem [shape: bf16[2,768], index: 0, kind: input, shape index: {}]   ;;  %s804_s1 = inlined_call_operand.hbm [shape: s8[768,512], index: 1, kind: input, shape index: {}]   ;;  %s805_s2 = inlined_call_operand.vmem [shape: f32[2,512], index: 2, kind: input, shape index: {}]   ;;  %s806_s3 = inlined_call_operand.vmem [shape: f32[2,128], index: 3, kind: output, shape index: {}]  }
   0x1   :  { %s16_s13 = sshll.u32 %s711_s12, 4  ;;  %s687_s16 = scalar_lea.hbm %s804_s1, 12288  ;;  %s17_s13 = int_to_ptr.vmem [resolvable:$true] %s16_s13 }
   0x2   :  { %p688_p0 = scmp.ne.s32.totalorder %s804_s1, %s687_s16  ;;  %p691_p1 = scmp.lt.u32.totalorder %s687_s16, %s804_s1 }
   0x4   :  { %p693_p2 = pnand %p691_p1, %p688_p0 }
   0x6   :  { %696 = shalt.err (!%p693_p2)
}
   0x7   :  { %s697_s21 = scalar_lea.vmem %s17_s13, 12288  ;;  %p702_p4 = scmp.lt.s32.totalorder %s17_s13, %s17_s13 }
   0x8   :  { %p698_p3 = scmp.ne.s32.totalorder %s17_s13, %s697_s21  ;;  %p703_p5 = scmp.lt.s32.totalorder %s697_s21, %s697_s21 }
   0xa   :  { %p704_p6 = por %p703_p5, %p702_p4 }
   0xc   :  { %p705_p7 = pnand %p704_p6, %p698_p3 }
   0xe   :  { %708 = shalt.err (!%p705_p7)
}
   0xf   :  { %s712_s22 = smov 512   ;;  %s713_s23 = smov 32  }
  0x10   :  { %22 = dma.hbm_to_vmem [thread:$0]  %s804_s1, 12288, %s17_s13, [#allocation3], %s712_s22, %s712_s22, %s713_s23  }
  0x11   :  { %709 = dma.done.wait [#allocation3], 12288  }
  0x12   :  { %710 = vsyncadd [#allocation3], 4294955008  ;;  %v30_v0 = vld [vmem:[#allocation2 + $0x8] sm:$0xff]  ;;  %v32_v1 = vld [vmem:[#allocation2 + $0x18] sm:$0xff]  ;;  %v714_v18 = vmov 1966171168   ;;  %v322_v20 = vlaneseq }
  0x13   :  { %v29_v2 = vld [vmem:[#allocation2] sm:$0xff]  ;;  %v126_v3 = vunpack.c.l.s8.bf16 %v30_v0  ;;  %v130_v4 = vunpack.c.h.s8.bf16 %v30_v0  ;;  %v128_v5 = vunpack.c.l.s8.bf16 %v32_v1  ;;  %v132_v6 = vunpack.c.h.s8.bf16 %v32_v1  ;;  %v31_v7 = vld [vmem:[#allocation2 + $0x10] sm:$0xff]  ;;  %v34_v10 = vld [vmem:[#allocation2 + $0x28] sm:$0xff] }
  0x14   :  { %v125_v8 = vunpack.c.l.s8.bf16 %v29_v2  ;;  %v127_v9 = vunpack.c.l.s8.bf16 %v31_v7  ;;  %v36_v11 = vld [vmem:[#allocation2 + $0x38] sm:$0xff]  ;;  %v129_v12 = vunpack.c.h.s8.bf16 %v29_v2  ;;  %v131_v13 = vunpack.c.h.s8.bf16 %v31_v7  ;;  %v33_v16 = vld [vmem:[#allocation2 + $0x20] sm:$0xff]  ;;  %v35_v17 = vld [vmem:[#allocation2 + $0x30] sm:$0xff] }
  0x15   :  { %371 = vmatprep.subr.bf16.mxu0 %v126_v3  ;;  %494 = vmatprep.subr.bf16.mxu1 %v128_v5  ;;  %v134_v14 = vunpack.c.l.s8.bf16 %v34_v10  ;;  %v136_v15 = vunpack.c.l.s8.bf16 %v36_v11  ;;  %v320_v19 = vunpack.c.l.s4 %v714_v18  ;;  %v133_v21 = vunpack.c.l.s8.bf16 %v33_v16  ;;  %v38_v27 = vld [vmem:[#allocation2 + $0x48] sm:$0xff]  ;;  %v40_v28 = vld [vmem:[#allocation2 + $0x58] sm:$0xff]  ;;  %v37_v33 = vld [vmem:[#allocation2 + $0x40] sm:$0xff] }
  0x16   :  { %372 = vmatpush1.bf16.msra.mxu0 %v125_v8  ;;  %495 = vmatpush1.bf16.msra.mxu1 %v127_v9  ;;  %v135_v22 = vunpack.c.l.s8.bf16 %v35_v17  ;;  %v138_v23 = vunpack.c.h.s8.bf16 %v34_v10  ;;  %v140_v24 = vunpack.c.h.s8.bf16 %v36_v11  ;;  %v748_v26 = vshrl.u32 %v322_v20, 7  ;;  %v39_v34 = vld [vmem:[#allocation2 + $0x50] sm:$0xff]  ;;  %v756_v36 = vld [vmem:[%s803_s0] sm:$0x3f]  ;;  %v42_v42 = vld [vmem:[#allocation2 + $0x68] sm:$0xff] }
  0x17   :  { %373 = vmatprep.subr.bf16.mxu0 %v130_v4  ;;  %496 = vmatprep.subr.bf16.mxu1 %v132_v6  ;;  %v321_v25 = vunpack.c.0.s8 %v320_v19  ;;  %v137_v29 = vunpack.c.h.s8.bf16 %v33_v16  ;;  %v139_v30 = vunpack.c.h.s8.bf16 %v35_v17  ;;  %v142_v31 = vunpack.c.l.s8.bf16 %v38_v27  ;;  %v44_v43 = vld [vmem:[#allocation2 + $0x78] sm:$0xff]  ;;  %v41_v49 = vld [vmem:[#allocation2 + $0x60] sm:$0xff]  ;;  %v43_v50 = vld [vmem:[#allocation2 + $0x70] sm:$0xff] }
  0x18   :  { %v144_v32 = vunpack.c.l.s8.bf16 %v40_v28  ;;  %v141_v37 = vunpack.c.l.s8.bf16 %v37_v33  ;;  %v143_v38 = vunpack.c.l.s8.bf16 %v39_v34  ;;  %v146_v39 = vunpack.c.h.s8.bf16 %v38_v27  ;;  %v46_v56 = vld [vmem:[#allocation2 + $0x88] sm:$0xff]  ;;  %v48_v57 = vld [vmem:[#allocation2 + $0x98] sm:$0xff]  ;;  %v45_v62 = vld [vmem:[#allocation2 + $0x80] sm:$0xff] }
  0x19   :  { %v751_v35 = vsub.s32 %v321_v25, %v748_v26  ;;  %v148_v40 = vunpack.c.h.s8.bf16 %v40_v28  ;;  %v145_v45 = vunpack.c.h.s8.bf16 %v37_v33  ;;  %v147_v46 = vunpack.c.h.s8.bf16 %v39_v34  ;;  %v47_v63 = vld [vmem:[#allocation2 + $0x90] sm:$0xff]  ;;  %v50_v4 = vld [vmem:[#allocation2 + $0xa8] sm:$0xff]  ;;  %v52_v5 = vld [vmem:[#allocation2 + $0xb8] sm:$0xff] }
  0x1a   :  { %374 = vmatpush1.bf16.msra.mxu0 %v129_v12  ;;  %497 = vmatpush1.bf16.msra.mxu1 %v131_v13  ;;  %v150_v47 = vunpack.c.l.s8.bf16 %v42_v42  ;;  %v152_v48 = vunpack.c.l.s8.bf16 %v44_v43  ;;  %v149_v52 = vunpack.c.l.s8.bf16 %v41_v49  ;;  %v151_v53 = vunpack.c.l.s8.bf16 %v43_v50  ;;  %v49_v10 = vld [vmem:[#allocation2 + $0xa0] sm:$0xff]  ;;  %v51_v11 = vld [vmem:[#allocation2 + $0xb0] sm:$0xff]  ;;  %v54_v16 = vld [vmem:[#allocation2 + $0xc8] sm:$0xff] }
  0x1b   :  { %375 = vmatprep.subr.bf16.mxu0 %v134_v14  ;;  %498 = vmatprep.subr.bf16.mxu1 %v136_v15  ;;  %v760_v41 = vrot.slane %v756_v36, %v751_v35  ;;  %v154_v54 = vunpack.c.h.s8.bf16 %v42_v42  ;;  %v156_v55 = vunpack.c.h.s8.bf16 %v44_v43  ;;  %v153_v58 = vunpack.c.h.s8.bf16 %v41_v49  ;;  %v56_v17 = vld [vmem:[#allocation2 + $0xd8] sm:$0xff] }
  0x1c   :  { %v155_v59 = vunpack.c.h.s8.bf16 %v43_v50  ;;  %v158_v60 = vunpack.c.l.s8.bf16 %v46_v56  ;;  %v160_v61 = vunpack.c.l.s8.bf16 %v48_v57  ;;  %v157_v0 = vunpack.c.l.s8.bf16 %v45_v62 }
  0x1d   :  { %v333_v44 = vcombine.high %v760_v41, %v760_v41  ;;  %v159_v1 = vunpack.c.l.s8.bf16 %v47_v63  ;;  %v162_v2 = vunpack.c.h.s8.bf16 %v46_v56  ;;  %v164_v3 = vunpack.c.h.s8.bf16 %v48_v57 }
  0x1e   :  { %376 = vmatpush1.bf16.msra.mxu0 %v133_v21  ;;  %499 = vmatpush1.bf16.msra.mxu1 %v135_v22  ;;  %v161_v6 = vunpack.c.h.s8.bf16 %v45_v62  ;;  %v163_v7 = vunpack.c.h.s8.bf16 %v47_v63  ;;  %v166_v8 = vunpack.c.l.s8.bf16 %v50_v4  ;;  %v168_v9 = vunpack.c.l.s8.bf16 %v52_v5  ;;  %v53_v22 = vld [vmem:[#allocation2 + $0xc0] sm:$0xff]  ;;  %v66_v62 = vld [vmem:[#allocation2 + $0x128] sm:$0xff]  ;;  %v68_v63 = vld [vmem:[#allocation2 + $0x138] sm:$0xff] }
  0x1f   :  { %377 = vmatprep.subr.bf16.mxu0 %v138_v23  ;;  %500 = vmatprep.subr.bf16.mxu1 %v140_v24  ;;  %v765_v51 = vrot.slane %v333_v44, %v751_v35  ;;  %v165_v12 = vunpack.c.l.s8.bf16 %v49_v10  ;;  %v167_v13 = vunpack.c.l.s8.bf16 %v51_v11  ;;  %v170_v14 = vunpack.c.h.s8.bf16 %v50_v4  ;;  %v55_v23 = vld [vmem:[#allocation2 + $0xd0] sm:$0xff]  ;;  %v62_v44 = vld [vmem:[#allocation2 + $0x108] sm:$0xff] }
  0x20   :  { %v172_v15 = vunpack.c.h.s8.bf16 %v52_v5  ;;  %v169_v18 = vunpack.c.h.s8.bf16 %v49_v10  ;;  %v171_v19 = vunpack.c.h.s8.bf16 %v51_v11  ;;  %v174_v20 = vunpack.c.l.s8.bf16 %v54_v16  ;;  %v67_v4 = vld [vmem:[#allocation2 + $0x130] sm:$0xff] }
  0x21   :  { %403 = vmatprep.mubr.bf16.mxu0 %v765_v51  ;;  %526 = vmatprep.mubr.bf16.mxu1 %v765_v51  ;;  %v176_v21 = vunpack.c.l.s8.bf16 %v56_v17  ;;  %v173_v24 = vunpack.c.l.s8.bf16 %v53_v22  ;;  %v175_v25 = vunpack.c.l.s8.bf16 %v55_v23  ;;  %v178_v27 = vunpack.c.h.s8.bf16 %v54_v16 }
  0x22   :  { %378 = vmatpush1.bf16.msra.mxu0 %v137_v29  ;;  %501 = vmatpush1.bf16.msra.mxu1 %v139_v30  ;;  %v180_v28 = vunpack.c.h.s8.bf16 %v56_v17  ;;  %v58_v29 = vld [vmem:[#allocation2 + $0xe8] sm:$0xff]  ;;  %v60_v30 = vld [vmem:[#allocation2 + $0xf8] sm:$0xff]  ;;  %v190_v50 = vunpack.c.l.s8.bf16 %v62_v44  ;;  %v774_v56 = vrot.slane %v760_v41, %v751_v35  ;;  %v364_v41 = vcombine.high %v765_v51, %v765_v51 }
  0x23   :  { %379 = vmatprep.subr.bf16.mxu0 %v142_v31  ;;  %502 = vmatprep.subr.bf16.mxu1 %v144_v32  ;;  %v177_v31 = vunpack.c.h.s8.bf16 %v53_v22  ;;  %v179_v32 = vunpack.c.h.s8.bf16 %v55_v23  ;;  %v182_v33 = vunpack.c.l.s8.bf16 %v58_v29  ;;  %v184_v34 = vunpack.c.l.s8.bf16 %v60_v30 }
  0x24   :  { %v186_v42 = vunpack.c.h.s8.bf16 %v58_v29  ;;  %v188_v43 = vunpack.c.h.s8.bf16 %v60_v30  ;;  %v199_v51 = vunpack.c.l.s8.bf16 %v67_v4  ;;  %v203_v11 = vunpack.c.h.s8.bf16 %v67_v4  ;;  %v87_v4 = vld [vmem:[#allocation2 + $0x1d0] sm:$0xff] }
  0x25   :  { %vm648_vm0 = vcmask 1041408  }
  0x26   :  { %380 = vmatpush1.bf16.msra.mxu0 %v141_v37  ;;  %503 = vmatpush1.bf16.msra.mxu1 %v143_v38  ;;  %v57_v37 = vld [vmem:[#allocation2 + $0xe0] sm:$0xff]  ;;  %v59_v38 = vld [vmem:[#allocation2 + $0xf0] sm:$0xff] }
  0x27   :  { %381 = vmatprep.subr.bf16.mxu0 %v146_v39  ;;  %504 = vmatprep.subr.bf16.mxu1 %v148_v40  ;;  %v181_v39 = vunpack.c.l.s8.bf16 %v57_v37  ;;  %v183_v40 = vunpack.c.l.s8.bf16 %v59_v38 }
  0x2a   :  { %382 = vmatpush1.bf16.msra.mxu0 %v145_v45  ;;  %505 = vmatpush1.bf16.msra.mxu1 %v147_v46  ;;  %v64_v45 = vld [vmem:[#allocation2 + $0x118] sm:$0xff]  ;;  %v318_v46 = vcombine.high %v756_v36, %v756_v36 }
  0x2b   :  { %383 = vmatprep.subr.bf16.mxu0 %v150_v47  ;;  %506 = vmatprep.subr.bf16.mxu1 %v152_v48  ;;  %v185_v47 = vunpack.c.h.s8.bf16 %v57_v37  ;;  %v187_v48 = vunpack.c.h.s8.bf16 %v59_v38 }
  0x2c   :  { %v332_v49 = vrot.slane %v318_v46, %v751_v35 }
  0x2e   :  { %384 = vmatpush1.bf16.msra.mxu0 %v149_v52  ;;  %507 = vmatpush1.bf16.msra.mxu1 %v151_v53  ;;  %v192_v52 = vunpack.c.l.s8.bf16 %v64_v45  ;;  %v61_v53 = vld [vmem:[#allocation2 + $0x100] sm:$0xff] }
  0x2f   :  { %385 = vmatprep.subr.bf16.mxu0 %v154_v54  ;;  %508 = vmatprep.subr.bf16.mxu1 %v156_v55  ;;  %v63_v54 = vld [vmem:[#allocation2 + $0x110] sm:$0xff]  ;;  %v334_v55 = vcombine.high %v332_v49, %v332_v49  ;;  %v189_v36 = vunpack.c.l.s8.bf16 %v61_v53 }
  0x30   :  { %v191_v57 = vunpack.c.l.s8.bf16 %v63_v54 }
  0x32   :  { %386 = vmatpush1.bf16.msra.mxu0 %v153_v58  ;;  %509 = vmatpush1.bf16.msra.mxu1 %v155_v59  ;;  %v777_v58 = vrot.slane %v334_v55, %v751_v35  ;;  %v780_v59 = vrot.slane %v332_v49, %v751_v35  ;;  %v198_v35 = vunpack.c.l.s8.bf16 %v66_v62  ;;  %v84_v49 = vld [vmem:[#allocation2 + $0x1b8] sm:$0xff]  ;;  %v81_v55 = vld [vmem:[#allocation2 + $0x1a0] sm:$0xff] }
  0x33   :  { %387 = vmatprep.subr.bf16.mxu0 %v158_v60  ;;  %510 = vmatprep.subr.bf16.mxu1 %v160_v61  ;;  %v194_v60 = vunpack.c.h.s8.bf16 %v62_v44  ;;  %v196_v61 = vunpack.c.h.s8.bf16 %v64_v45 }
  0x36   :  { %388 = vmatpush1.bf16.msra.mxu0 %v157_v0  ;;  %511 = vmatpush1.bf16.msra.mxu1 %v159_v1  ;;  %v193_v0 = vunpack.c.h.s8.bf16 %v61_v53  ;;  %v195_v1 = vunpack.c.h.s8.bf16 %v63_v54  ;;  %v232_v54 = vunpack.c.l.s8.bf16 %v84_v49 }
  0x37   :  { %389 = vmatprep.subr.bf16.mxu0 %v162_v2  ;;  %512 = vmatprep.subr.bf16.mxu1 %v164_v3  ;;  %v200_v2 = vunpack.c.l.s8.bf16 %v68_v63  ;;  %v65_v3 = vld [vmem:[#allocation2 + $0x120] sm:$0xff] }
  0x38   :  { %v197_v5 = vunpack.c.l.s8.bf16 %v65_v3  ;;  %v201_v10 = vunpack.c.h.s8.bf16 %v65_v3  ;;  %v85_v3 = vld [vmem:[#allocation2 + $0x1c0] sm:$0xff] }
  0x3a   :  { %390 = vmatpush1.bf16.msra.mxu0 %v161_v6  ;;  %513 = vmatpush1.bf16.msra.mxu1 %v163_v7  ;;  %v202_v6 = vunpack.c.h.s8.bf16 %v66_v62  ;;  %v204_v7 = vunpack.c.h.s8.bf16 %v68_v63  ;;  %v236_v62 = vunpack.c.h.s8.bf16 %v84_v49  ;;  %v86_v63 = vld [vmem:[#allocation2 + $0x1c8] sm:$0xff]  ;;  %v104_v49 = vld [vmem:[#allocation2 + $0x258] sm:$0xff] }
  0x3b   :  { %391 = vmatprep.subr.bf16.mxu0 %v166_v8  ;;  %514 = vmatprep.subr.bf16.mxu1 %v168_v9  ;;  %v70_v8 = vld [vmem:[#allocation2 + $0x148] sm:$0xff]  ;;  %v72_v9 = vld [vmem:[#allocation2 + $0x158] sm:$0xff] }
  0x3e   :  { %392 = vmatpush1.bf16.msra.mxu0 %v165_v12  ;;  %515 = vmatpush1.bf16.msra.mxu1 %v167_v13  ;;  %v206_v12 = vunpack.c.l.s8.bf16 %v70_v8  ;;  %v208_v13 = vunpack.c.l.s8.bf16 %v72_v9 }
  0x3f   :  { %393 = vmatprep.subr.bf16.mxu0 %v170_v14  ;;  %516 = vmatprep.subr.bf16.mxu1 %v172_v15  ;;  %v69_v14 = vld [vmem:[#allocation2 + $0x140] sm:$0xff]  ;;  %v71_v15 = vld [vmem:[#allocation2 + $0x150] sm:$0xff] }
  0x40   :  { %v205_v16 = vunpack.c.l.s8.bf16 %v69_v14  ;;  %v207_v17 = vunpack.c.l.s8.bf16 %v71_v15  ;;  %v209_v22 = vunpack.c.h.s8.bf16 %v69_v14  ;;  %v211_v23 = vunpack.c.h.s8.bf16 %v71_v15  ;;  %v89_v14 = vld [vmem:[#allocation2 + $0x1e0] sm:$0xff]  ;;  %v91_v15 = vld [vmem:[#allocation2 + $0x1f0] sm:$0xff] }
  0x42   :  { %394 = vmatpush1.bf16.msra.mxu0 %v169_v18  ;;  %517 = vmatpush1.bf16.msra.mxu1 %v171_v19  ;;  %v210_v18 = vunpack.c.h.s8.bf16 %v70_v8  ;;  %v212_v19 = vunpack.c.h.s8.bf16 %v72_v9  ;;  %v90_v8 = vld [vmem:[#allocation2 + $0x1e8] sm:$0xff]  ;;  %v92_v9 = vld [vmem:[#allocation2 + $0x1f8] sm:$0xff] }
  0x43   :  { %395 = vmatprep.subr.bf16.mxu0 %v174_v20  ;;  %518 = vmatprep.subr.bf16.mxu1 %v176_v21  ;;  %v74_v20 = vld [vmem:[#allocation2 + $0x168] sm:$0xff]  ;;  %v76_v21 = vld [vmem:[#allocation2 + $0x178] sm:$0xff] }
  0x46   :  { %396 = vmatpush1.bf16.msra.mxu0 %v173_v24  ;;  %519 = vmatpush1.bf16.msra.mxu1 %v175_v25  ;;  %v214_v24 = vunpack.c.l.s8.bf16 %v74_v20  ;;  %v216_v25 = vunpack.c.l.s8.bf16 %v76_v21 }
  0x47   :  { %397 = vmatprep.subr.bf16.mxu0 %v178_v27  ;;  %520 = vmatprep.subr.bf16.mxu1 %v180_v28  ;;  %v73_v27 = vld [vmem:[#allocation2 + $0x160] sm:$0xff]  ;;  %v75_v28 = vld [vmem:[#allocation2 + $0x170] sm:$0xff] }
  0x48   :  { %v213_v29 = vunpack.c.l.s8.bf16 %v73_v27  ;;  %v215_v30 = vunpack.c.l.s8.bf16 %v75_v28  ;;  %v217_v37 = vunpack.c.h.s8.bf16 %v73_v27  ;;  %v219_v38 = vunpack.c.h.s8.bf16 %v75_v28  ;;  %v93_v27 = vld [vmem:[#allocation2 + $0x200] sm:$0xff]  ;;  %v95_v28 = vld [vmem:[#allocation2 + $0x210] sm:$0xff] }
  0x4a   :  { %398 = vmatpush1.bf16.msra.mxu0 %v177_v31  ;;  %521 = vmatpush1.bf16.msra.mxu1 %v179_v32  ;;  %v218_v31 = vunpack.c.h.s8.bf16 %v74_v20  ;;  %v220_v32 = vunpack.c.h.s8.bf16 %v76_v21  ;;  %v94_v20 = vld [vmem:[#allocation2 + $0x208] sm:$0xff]  ;;  %v96_v21 = vld [vmem:[#allocation2 + $0x218] sm:$0xff] }
  0x4b   :  { %399 = vmatprep.subr.bf16.mxu0 %v182_v33  ;;  %522 = vmatprep.subr.bf16.mxu1 %v184_v34  ;;  %v78_v33 = vld [vmem:[#allocation2 + $0x188] sm:$0xff]  ;;  %v80_v34 = vld [vmem:[#allocation2 + $0x198] sm:$0xff] }
  0x4c   :  { %v226_v46 = vunpack.c.h.s8.bf16 %v78_v33 }
  0x4e   :  { %400 = vmatpush1.bf16.msra.mxu0 %v181_v39  ;;  %523 = vmatpush1.bf16.msra.mxu1 %v183_v40  ;;  %v222_v39 = vunpack.c.l.s8.bf16 %v78_v33  ;;  %v224_v40 = vunpack.c.l.s8.bf16 %v80_v34  ;;  %v260_v33 = vunpack.c.h.s8.bf16 %v96_v21 }
  0x4f   :  { %401 = vmatprep.subr.bf16.mxu0 %v186_v42  ;;  %524 = vmatprep.subr.bf16.mxu1 %v188_v43  ;;  %v77_v42 = vld [vmem:[#allocation2 + $0x180] sm:$0xff]  ;;  %v79_v43 = vld [vmem:[#allocation2 + $0x190] sm:$0xff] }
  0x50   :  { %v221_v44 = vunpack.c.l.s8.bf16 %v77_v42  ;;  %v223_v45 = vunpack.c.l.s8.bf16 %v79_v43 }
  0x52   :  { %402 = vmatpush1.bf16.msra.mxu0 %v185_v47  ;;  %525 = vmatpush1.bf16.msra.mxu1 %v187_v48  ;;  %v228_v47 = vunpack.c.h.s8.bf16 %v80_v34  ;;  %v82_v48 = vld [vmem:[#allocation2 + $0x1a8] sm:$0xff] }
  0x53   :  { %412 = vmatprep.subr.bf16.mxu0 %v190_v50  ;;  %535 = vmatprep.subr.bf16.mxu1 %v192_v52  ;;  %v225_v50 = vunpack.c.h.s8.bf16 %v77_v42  ;;  %v227_v52 = vunpack.c.h.s8.bf16 %v79_v43  ;;  %v230_v53 = vunpack.c.l.s8.bf16 %v82_v48  ;;  %v98_v34 = vld [vmem:[#allocation2 + $0x228] sm:$0xff]  ;;  %v97_v42 = vld [vmem:[#allocation2 + $0x220] sm:$0xff]  ;;  %v99_v43 = vld [vmem:[#allocation2 + $0x230] sm:$0xff] }
  0x55   :  { %404 = vmatmul.mubr.bf16.vlgmr.msra.gmra.mrb[0].mxu0 %v774_v56  ;;  %527 = vmatmul.mubr.bf16.vlgmr.msra.gmra.mrb[0].mxu1 %v774_v56 }
  0x56   :  { %413 = vmatpush1.bf16.msra.mxu0 %v189_v36  ;;  %536 = vmatpush1.bf16.msra.mxu1 %v191_v57  ;;  %v83_v36 = vld [vmem:[#allocation2 + $0x1b0] sm:$0xff]  ;;  %v229_v57 = vunpack.c.l.s8.bf16 %v81_v55 }
  0x57   :  { %414 = vmatprep.subr.bf16.mxu0 %v194_v60  ;;  %537 = vmatprep.subr.bf16.mxu1 %v196_v61  ;;  %v231_v60 = vunpack.c.l.s8.bf16 %v83_v36  ;;  %v234_v61 = vunpack.c.h.s8.bf16 %v82_v48  ;;  %v102_v48 = vld [vmem:[#allocation2 + $0x248] sm:$0xff] }
  0x58   :  { %444 = vmatprep.mubr.bf16.mxu0 %v364_v41  ;;  %567 = vmatprep.mubr.bf16.mxu1 %v364_v41  ;;  %v88_v41 = vld [vmem:[#allocation2 + $0x1d8] sm:$0xff] }
  0x5a   :  { %415 = vmatpush1.bf16.msra.mxu0 %v193_v0  ;;  %538 = vmatpush1.bf16.msra.mxu1 %v195_v1  ;;  %v233_v0 = vunpack.c.h.s8.bf16 %v81_v55  ;;  %v235_v1 = vunpack.c.h.s8.bf16 %v83_v36  ;;  %v101_v55 = vld [vmem:[#allocation2 + $0x240] sm:$0xff] }
  0x5b   :  { %416 = vmatprep.subr.bf16.mxu0 %v198_v35  ;;  %539 = vmatprep.subr.bf16.mxu1 %v200_v2  ;;  %v238_v35 = vunpack.c.l.s8.bf16 %v86_v63  ;;  %v240_v2 = vunpack.c.l.s8.bf16 %v88_v41  ;;  %v269_v36 = vunpack.c.l.s8.bf16 %v101_v55 }
  0x5e   :  { %417 = vmatpush1.bf16.msra.mxu0 %v197_v5  ;;  %540 = vmatpush1.bf16.msra.mxu1 %v199_v51  ;;  %v237_v5 = vunpack.c.l.s8.bf16 %v85_v3  ;;  %v239_v51 = vunpack.c.l.s8.bf16 %v87_v4 }
  0x5f   :  { %418 = vmatprep.subr.bf16.mxu0 %v202_v6  ;;  %541 = vmatprep.subr.bf16.mxu1 %v204_v7  ;;  %v242_v6 = vunpack.c.h.s8.bf16 %v86_v63  ;;  %v244_v7 = vunpack.c.h.s8.bf16 %v88_v41  ;;  %v108_v63 = vld [vmem:[#allocation2 + $0x278] sm:$0xff]  ;;  %v273_v41 = vunpack.c.h.s8.bf16 %v101_v55 }
  0x62   :  { %419 = vmatpush1.bf16.msra.mxu0 %v201_v10  ;;  %542 = vmatpush1.bf16.msra.mxu1 %v203_v11  ;;  %v241_v10 = vunpack.c.h.s8.bf16 %v85_v3  ;;  %v243_v11 = vunpack.c.h.s8.bf16 %v87_v4  ;;  %v107_v3 = vld [vmem:[#allocation2 + $0x270] sm:$0xff] }
  0x63   :  { %420 = vmatprep.subr.bf16.mxu0 %v206_v12  ;;  %543 = vmatprep.subr.bf16.mxu1 %v208_v13  ;;  %v246_v12 = vunpack.c.l.s8.bf16 %v90_v8  ;;  %v248_v13 = vunpack.c.l.s8.bf16 %v92_v9 }
  0x66   :  { %421 = vmatpush1.bf16.msra.mxu0 %v205_v16  ;;  %544 = vmatpush1.bf16.msra.mxu1 %v207_v17  ;;  %v245_v16 = vunpack.c.l.s8.bf16 %v89_v14  ;;  %v247_v17 = vunpack.c.l.s8.bf16 %v91_v15 }
  0x67   :  { %422 = vmatprep.subr.bf16.mxu0 %v210_v18  ;;  %545 = vmatprep.subr.bf16.mxu1 %v212_v19  ;;  %v250_v18 = vunpack.c.h.s8.bf16 %v90_v8  ;;  %v252_v19 = vunpack.c.h.s8.bf16 %v92_v9  ;;  %v112_v8 = vld [vmem:[#allocation2 + $0x298] sm:$0xff] }
  0x6a   :  { %423 = vmatpush1.bf16.msra.mxu0 %v209_v22  ;;  %546 = vmatpush1.bf16.msra.mxu1 %v211_v23  ;;  %v249_v22 = vunpack.c.h.s8.bf16 %v89_v14  ;;  %v251_v23 = vunpack.c.h.s8.bf16 %v91_v15  ;;  %v111_v14 = vld [vmem:[#allocation2 + $0x290] sm:$0xff] }
  0x6b   :  { %424 = vmatprep.subr.bf16.mxu0 %v214_v24  ;;  %547 = vmatprep.subr.bf16.mxu1 %v216_v25  ;;  %v254_v24 = vunpack.c.l.s8.bf16 %v94_v20  ;;  %v256_v25 = vunpack.c.l.s8.bf16 %v96_v21 }
  0x6e   :  { %425 = vmatpush1.bf16.msra.mxu0 %v213_v29  ;;  %548 = vmatpush1.bf16.msra.mxu1 %v215_v30  ;;  %v363_v29 = vcombine.high %v774_v56, %v774_v56  ;;  %v253_v30 = vunpack.c.l.s8.bf16 %v93_v27 }
  0x6f   :  { %426 = vmatprep.subr.bf16.mxu0 %v218_v31  ;;  %549 = vmatprep.subr.bf16.mxu1 %v220_v32  ;;  %v255_v31 = vunpack.c.l.s8.bf16 %v95_v28  ;;  %v258_v32 = vunpack.c.h.s8.bf16 %v94_v20  ;;  %v116_v20 = vld [vmem:[#allocation2 + $0x2b8] sm:$0xff] }
  0x72   :  { %427 = vmatpush1.bf16.msra.mxu0 %v217_v37  ;;  %550 = vmatpush1.bf16.msra.mxu1 %v219_v38  ;;  %v100_v37 = vld [vmem:[#allocation2 + $0x238] sm:$0xff]  ;;  %v257_v38 = vunpack.c.h.s8.bf16 %v93_v27  ;;  %v115_v27 = vld [vmem:[#allocation2 + $0x2b0] sm:$0xff] }
  0x73   :  { %428 = vmatprep.subr.bf16.mxu0 %v222_v39  ;;  %551 = vmatprep.subr.bf16.mxu1 %v224_v40  ;;  %v259_v39 = vunpack.c.h.s8.bf16 %v95_v28  ;;  %v262_v40 = vunpack.c.l.s8.bf16 %v98_v34  ;;  %v264_v56 = vunpack.c.l.s8.bf16 %v100_v37 }
  0x76   :  { %429 = vmatpush1.bf16.msra.mxu0 %v221_v44  ;;  %552 = vmatpush1.bf16.msra.mxu1 %v223_v45  ;;  %v261_v44 = vunpack.c.l.s8.bf16 %v97_v42  ;;  %v263_v45 = vunpack.c.l.s8.bf16 %v99_v43 }
  0x77   :  { %430 = vmatprep.subr.bf16.mxu0 %v226_v46  ;;  %553 = vmatprep.subr.bf16.mxu1 %v228_v47  ;;  %v266_v46 = vunpack.c.h.s8.bf16 %v98_v34  ;;  %v268_v47 = vunpack.c.h.s8.bf16 %v100_v37  ;;  %v299_v37 = vunpack.c.h.s8.bf16 %v115_v27 }
  0x7a   :  { %431 = vmatpush1.bf16.msra.mxu0 %v225_v50  ;;  %554 = vmatpush1.bf16.msra.mxu1 %v227_v52  ;;  %v265_v50 = vunpack.c.h.s8.bf16 %v97_v42  ;;  %v267_v52 = vunpack.c.h.s8.bf16 %v99_v43 }
  0x7b   :  { %432 = vmatprep.subr.bf16.mxu0 %v230_v53  ;;  %555 = vmatprep.subr.bf16.mxu1 %v232_v54  ;;  %v270_v53 = vunpack.c.l.s8.bf16 %v102_v48  ;;  %v272_v54 = vunpack.c.l.s8.bf16 %v104_v49 }
  0x7e   :  { %433 = vmatpush1.bf16.msra.mxu0 %v229_v57  ;;  %556 = vmatpush1.bf16.msra.mxu1 %v231_v60  ;;  %v274_v60 = vunpack.c.h.s8.bf16 %v102_v48 }
  0x7f   :  { %434 = vmatprep.subr.bf16.mxu0 %v234_v61  ;;  %557 = vmatprep.subr.bf16.mxu1 %v236_v62  ;;  %v276_v61 = vunpack.c.h.s8.bf16 %v104_v49  ;;  %v106_v62 = vld [vmem:[#allocation2 + $0x268] sm:$0xff] }
  0x82   :  { %435 = vmatpush1.bf16.msra.mxu0 %v233_v0  ;;  %558 = vmatpush1.bf16.msra.mxu1 %v235_v1  ;;  %v278_v1 = vunpack.c.l.s8.bf16 %v106_v62 }
  0x83   :  { %436 = vmatprep.subr.bf16.mxu0 %v238_v35  ;;  %559 = vmatprep.subr.bf16.mxu1 %v240_v2  ;;  %v280_v35 = vunpack.c.l.s8.bf16 %v108_v63  ;;  %v105_v2 = vld [vmem:[#allocation2 + $0x260] sm:$0xff] }
  0x84   :  { %v277_v4 = vunpack.c.l.s8.bf16 %v105_v2  ;;  %v281_v9 = vunpack.c.h.s8.bf16 %v105_v2 }
  0x86   :  { %437 = vmatpush1.bf16.msra.mxu0 %v237_v5  ;;  %560 = vmatpush1.bf16.msra.mxu1 %v239_v51  ;;  %v279_v5 = vunpack.c.l.s8.bf16 %v107_v3  ;;  %v282_v51 = vunpack.c.h.s8.bf16 %v106_v62  ;;  %v715_v62 = vmov 1983009808  }
  0x87   :  { %438 = vmatprep.subr.bf16.mxu0 %v242_v6  ;;  %561 = vmatprep.subr.bf16.mxu1 %v244_v7  ;;  %v284_v6 = vunpack.c.h.s8.bf16 %v108_v63  ;;  %v110_v7 = vld [vmem:[#allocation2 + $0x288] sm:$0xff]  ;;  %v625_v63 = vunpack.c.l.s4 %v715_v62 }
  0x8a   :  { %439 = vmatpush1.bf16.msra.mxu0 %v241_v10  ;;  %562 = vmatpush1.bf16.msra.mxu1 %v243_v11  ;;  %v283_v10 = vunpack.c.h.s8.bf16 %v107_v3  ;;  %v286_v11 = vunpack.c.l.s8.bf16 %v110_v7 }
  0x8b   :  { %440 = vmatprep.subr.bf16.mxu0 %v246_v12  ;;  %563 = vmatprep.subr.bf16.mxu1 %v248_v13  ;;  %v288_v12 = vunpack.c.l.s8.bf16 %v112_v8  ;;  %v109_v13 = vld [vmem:[#allocation2 + $0x280] sm:$0xff] }
  0x8c   :  { %v285_v15 = vunpack.c.l.s8.bf16 %v109_v13  ;;  %v289_v21 = vunpack.c.h.s8.bf16 %v109_v13 }
  0x8e   :  { %441 = vmatpush1.bf16.msra.mxu0 %v245_v16  ;;  %564 = vmatpush1.bf16.msra.mxu1 %v247_v17  ;;  %v287_v16 = vunpack.c.l.s8.bf16 %v111_v14  ;;  %v290_v17 = vunpack.c.h.s8.bf16 %v110_v7 }
  0x8f   :  { %442 = vmatprep.subr.bf16.mxu0 %v250_v18  ;;  %565 = vmatprep.subr.bf16.mxu1 %v252_v19  ;;  %v292_v18 = vunpack.c.h.s8.bf16 %v112_v8  ;;  %v114_v19 = vld [vmem:[#allocation2 + $0x2a8] sm:$0xff] }
  0x92   :  { %443 = vmatpush1.bf16.msra.mxu0 %v249_v22  ;;  %566 = vmatpush1.bf16.msra.mxu1 %v251_v23  ;;  %v291_v22 = vunpack.c.h.s8.bf16 %v111_v14  ;;  %v294_v23 = vunpack.c.l.s8.bf16 %v114_v19 }
  0x93   :  { %453 = vmatprep.subr.bf16.mxu0 %v254_v24  ;;  %576 = vmatprep.subr.bf16.mxu1 %v256_v25  ;;  %v296_v24 = vunpack.c.l.s8.bf16 %v116_v20  ;;  %v113_v25 = vld [vmem:[#allocation2 + $0x2a0] sm:$0xff] }
  0x94   :  { %v293_v28 = vunpack.c.l.s8.bf16 %v113_v25  ;;  %v297_v34 = vunpack.c.h.s8.bf16 %v113_v25 }
  0x95   :  { %445 = vmatmul.mubr.bf16.vlgmr.msra.gmra.mrb[0].mxu0 %v363_v29  ;;  %568 = vmatmul.mubr.bf16.vlgmr.msra.gmra.mrb[0].mxu1 %v363_v29  ;;  %v295_v29 = vunpack.c.l.s8.bf16 %v115_v27 }
  0x96   :  { %454 = vmatpush1.bf16.msra.mxu0 %v253_v30  ;;  %577 = vmatpush1.bf16.msra.mxu1 %v255_v31  ;;  %v298_v30 = vunpack.c.h.s8.bf16 %v114_v19  ;;  %v300_v31 = vunpack.c.h.s8.bf16 %v116_v20 }
  0x97   :  { %455 = vmatprep.subr.bf16.mxu0 %v258_v32  ;;  %578 = vmatprep.subr.bf16.mxu1 %v260_v33  ;;  %v118_v32 = vld [vmem:[#allocation2 + $0x2c8] sm:$0xff]  ;;  %v120_v33 = vld [vmem:[#allocation2 + $0x2d8] sm:$0xff] }
  0x98   :  { %485 = vmatprep.mubr.bf16.mxu0 %v777_v58  ;;  %608 = vmatprep.mubr.bf16.mxu1 %v777_v58  ;;  %v103_v58 = vld [vmem:[#allocation2 + $0x250] sm:$0xff] }
  0x99   :  { %v271_v57 = vunpack.c.l.s8.bf16 %v103_v58  ;;  %v275_v0 = vunpack.c.h.s8.bf16 %v103_v58 }
  0x9a   :  { %456 = vmatpush1.bf16.msra.mxu0 %v257_v38  ;;  %579 = vmatpush1.bf16.msra.mxu1 %v259_v39  ;;  %v302_v38 = vunpack.c.l.s8.bf16 %v118_v32  ;;  %v304_v39 = vunpack.c.l.s8.bf16 %v120_v33 }
  0x9b   :  { %457 = vmatprep.subr.bf16.mxu0 %v262_v40  ;;  %580 = vmatprep.subr.bf16.mxu1 %v264_v56  ;;  %v117_v40 = vld [vmem:[#allocation2 + $0x2c0] sm:$0xff]  ;;  %v119_v56 = vld [vmem:[#allocation2 + $0x2d0] sm:$0xff] }
  0x9c   :  { %v301_v42 = vunpack.c.l.s8.bf16 %v117_v40  ;;  %v303_v43 = vunpack.c.l.s8.bf16 %v119_v56  ;;  %v305_v48 = vunpack.c.h.s8.bf16 %v117_v40  ;;  %v307_v49 = vunpack.c.h.s8.bf16 %v119_v56 }
  0x9e   :  { %458 = vmatpush1.bf16.msra.mxu0 %v261_v44  ;;  %581 = vmatpush1.bf16.msra.mxu1 %v263_v45  ;;  %v306_v44 = vunpack.c.h.s8.bf16 %v118_v32  ;;  %v308_v45 = vunpack.c.h.s8.bf16 %v120_v33 }
  0x9f   :  { %459 = vmatprep.subr.bf16.mxu0 %v266_v46  ;;  %582 = vmatprep.subr.bf16.mxu1 %v268_v47  ;;  %v122_v46 = vld [vmem:[#allocation2 + $0x2e8] sm:$0xff]  ;;  %v124_v47 = vld [vmem:[#allocation2 + $0x2f8] sm:$0xff] }
  0xa2   :  { %460 = vmatpush1.bf16.msra.mxu0 %v265_v50  ;;  %583 = vmatpush1.bf16.msra.mxu1 %v267_v52  ;;  %v310_v50 = vunpack.c.l.s8.bf16 %v122_v46  ;;  %v312_v52 = vunpack.c.l.s8.bf16 %v124_v47 }
  0xa3   :  { %461 = vmatprep.subr.bf16.mxu0 %v270_v53  ;;  %584 = vmatprep.subr.bf16.mxu1 %v272_v54  ;;  %v121_v53 = vld [vmem:[#allocation2 + $0x2e0] sm:$0xff]  ;;  %v123_v54 = vld [vmem:[#allocation2 + $0x2f0] sm:$0xff] }
  0xa4   :  { %v309_v55 = vunpack.c.l.s8.bf16 %v121_v53  ;;  %v311_v58 = vunpack.c.l.s8.bf16 %v123_v54 }
  0xa6   :  { %462 = vmatpush1.bf16.msra.mxu0 %v269_v36  ;;  %585 = vmatpush1.bf16.msra.mxu1 %v271_v57  ;;  %v314_v36 = vunpack.c.h.s8.bf16 %v122_v46  ;;  %v316_v57 = vunpack.c.h.s8.bf16 %v124_v47 }
  0xa7   :  { %463 = vmatprep.subr.bf16.mxu0 %v274_v60  ;;  %586 = vmatprep.subr.bf16.mxu1 %v276_v61  ;;  %v313_v60 = vunpack.c.h.s8.bf16 %v121_v53  ;;  %v315_v61 = vunpack.c.h.s8.bf16 %v123_v54 }
  0xaa   :  { %464 = vmatpush1.bf16.msra.mxu0 %v273_v41  ;;  %587 = vmatpush1.bf16.msra.mxu1 %v275_v0  ;;  %v626_v41 = vunpack.c.0.s8 %v625_v63  ;;  %v621_v0 = vld [vmem:[%s805_s2] sm:$0xff] }
  0xab   :  { %465 = vmatprep.subr.bf16.mxu0 %v278_v1  ;;  %588 = vmatprep.subr.bf16.mxu1 %v280_v35  ;;  %v623_v35 = vcombine.high %v621_v0, %v621_v0 }
  0xac   :  { %v629_v1 = vsub.s32 %v626_v41, %v748_v26 }
  0xae   :  { %466 = vmatpush1.bf16.msra.mxu0 %v277_v4  ;;  %589 = vmatpush1.bf16.msra.mxu1 %v279_v5  ;;  %v630_v2 = vrot.slane %v621_v0, %v629_v1  ;;  %v637_v3 = vrot.slane %v623_v35, %v629_v1 }
  0xaf   :  { %467 = vmatprep.subr.bf16.mxu0 %v282_v51  ;;  %590 = vmatprep.subr.bf16.mxu1 %v284_v6 }
  0xb0   :  { %v638_v51 = vcombine.high %v630_v2, %v630_v2 }
  0xb2   :  { %468 = vmatpush1.bf16.msra.mxu0 %v281_v9  ;;  %591 = vmatpush1.bf16.msra.mxu1 %v283_v10 }
  0xb3   :  { %469 = vmatprep.subr.bf16.mxu0 %v286_v11  ;;  %592 = vmatprep.subr.bf16.mxu1 %v288_v12  ;;  %v639_v11 = vcombine.high %v637_v3, %v637_v3 }
  0xb6   :  { %470 = vmatpush1.bf16.msra.mxu0 %v285_v15  ;;  %593 = vmatpush1.bf16.msra.mxu1 %v287_v16 }
  0xb7   :  { %471 = vmatprep.subr.bf16.mxu0 %v290_v17  ;;  %594 = vmatprep.subr.bf16.mxu1 %v292_v18 }
  0xba   :  { %472 = vmatpush1.bf16.msra.mxu0 %v289_v21  ;;  %595 = vmatpush1.bf16.msra.mxu1 %v291_v22 }
  0xbb   :  { %473 = vmatprep.subr.bf16.mxu0 %v294_v23  ;;  %596 = vmatprep.subr.bf16.mxu1 %v296_v24 }
  0xbe   :  { %474 = vmatpush1.bf16.msra.mxu0 %v293_v28  ;;  %597 = vmatpush1.bf16.msra.mxu1 %v295_v29 }
  0xbf   :  { %475 = vmatprep.subr.bf16.mxu0 %v298_v30  ;;  %598 = vmatprep.subr.bf16.mxu1 %v300_v31 }
  0xc2   :  { %476 = vmatpush1.bf16.msra.mxu0 %v297_v34  ;;  %599 = vmatpush1.bf16.msra.mxu1 %v299_v37 }
  0xc3   :  { %477 = vmatprep.subr.bf16.mxu0 %v302_v38  ;;  %600 = vmatprep.subr.bf16.mxu1 %v304_v39 }
  0xc6   :  { %478 = vmatpush1.bf16.msra.mxu0 %v301_v42  ;;  %601 = vmatpush1.bf16.msra.mxu1 %v303_v43 }
  0xc7   :  { %479 = vmatprep.subr.bf16.mxu0 %v306_v44  ;;  %602 = vmatprep.subr.bf16.mxu1 %v308_v45 }
  0xca   :  { %480 = vmatpush1.bf16.msra.mxu0 %v305_v48  ;;  %603 = vmatpush1.bf16.msra.mxu1 %v307_v49 }
  0xcb   :  { %481 = vmatprep.subr.bf16.mxu0 %v310_v50  ;;  %604 = vmatprep.subr.bf16.mxu1 %v312_v52 }
  0xce   :  { %482 = vmatpush1.bf16.msra.mxu0 %v309_v55  ;;  %605 = vmatpush1.bf16.msra.mxu1 %v311_v58 }
  0xcf   :  { %483 = vmatprep.subr.bf16.mxu0 %v314_v36  ;;  %606 = vmatprep.subr.bf16.mxu1 %v316_v57 }
  0xd2   :  { %484 = vmatpush1.bf16.msra.mxu0 %v313_v60  ;;  %607 = vmatpush1.bf16.msra.mxu1 %v315_v61 }
  0xd5   :  { %486 = vmatmul.mubr.bf16.vlgmr.msra.gmra.mrb[0].mxu0 %v780_v59  ;;  %609 = vmatmul.mubr.bf16.vlgmr.msra.gmra.mrb[0].mxu1 %v780_v59 }
 0x1a8   :  { %v487_v4 = vpop.f32.mrb[0].mxu0  ;;  %v610_v5 = vpop.f32.mrb[0].mxu1 }
 0x1a9   :  { %v617_v6 = vand.u32 2147483647, %v487_v4  ;;  %v619_v7 = vand.u32 2147483647, %v610_v5  ;;  %v489_v8 = vpop.f32.mrb[1].mxu0  ;;  %v612_v59 = vpop.f32.mrb[1].mxu1 }
 0x1aa   :  { %v618_v9 = vand.u32 2147483647, %v489_v8  ;;  %v620_v10 = vand.u32 2147483647, %v612_v59  ;;  %v491_v12 = vpop.f32.mrb[2].mxu0  ;;  %v614_v13 = vpop.f32.mrb[2].mxu1 }
 0x1ab   :  { %v644_v14 = vmul.f32 %v630_v2, %v617_v6  ;;  %v492_v15 = vpop.f32.mrb[3].mxu0  ;;  %v615_v16 = vpop.f32.mrb[3].mxu1  ;;  %v646_v26 = vmul.f32 %v637_v3, %v619_v7 }
 0x1ac   :  { %v645_v17 = vmul.f32 %v638_v51, %v618_v9  ;;  %v647_v20 = vmul.f32 %v639_v11, %v620_v10 }
 0x1ad   :  { %v649_v18 = vsel %vm648_vm0, %v644_v14, 0.0  ;;  %v652_v22 = vsel %vm648_vm0, %v646_v26, 0.0 }
 0x1ae   :  { %v650_v19 = vsel %vm648_vm0, %v645_v17, 0.0  ;;  %v654_v24 = vsel %vm648_vm0, %v647_v20, 0.0 }
 0x1af   :  { %v651_v21 = vadd.f32 %v650_v19, %v649_v18 }
 0x1b1   :  { %v653_v23 = vadd.f32 %v652_v22, %v651_v21 }
 0x1b3   :  { %v655_v25 = vadd.f32 %v654_v24, %v653_v23 }
 0x1b5   :  { %656 = vadd.xlane.f32.xlu0 %v655_v25 }
 0x242   :  { %v657_v27 = vpop.xlane.xlu0 %656 }
 0x243   :  { %658 = vst [vmem:[%s806_s3] sm:$0x3] %v657_v27 }
 0x244   :  { %663 = vsyncpa [#allocation3], 1 }

</bundles_post_ra>
